<compile_context>
chip_gen: v7x
topology: tpu7x:2x2x1
jax: 0.10.0
libtpu: 0.0.40
codegen_flags: <defaults>
</compile_context>

<pallas_src>
import jax
import jax.numpy as jnp
from jax.experimental import pallas as pl
from jax.experimental.pallas import tpu as pltpu


_LANE_CANDIDATES = (2048, 1024, 512, 256, 128)   # prefer wide, unmasked vst/vld
_VMEM_LIMIT_BYTES = 32 * 1024 * 1024             # safe on v5e/v6e/v7x (raises v5e default)
_VMEM_BUDGET_BYTES = 16 * 1024 * 1024            # total double-buffered block footprint
_TARGET_BLOCK_BYTES = 2 * 1024 * 1024            # ~2 MiB per-input block (HBM-roofline regime)


def _min_sublane(dtype):
    """Minimum sublane multiple for the dtype's (sublane, 128) tile."""
    itemsize = jnp.dtype(dtype).itemsize
    return {4: 8, 2: 16, 1: 32}.get(itemsize, 8)


def _round_up(x, m):
    return ((x + m - 1) // m) * m


def _make_add_kernel(n_inputs: int):
    """Kernel that sums `n_inputs` VMEM tiles elementwise."""

    def add_kernel(*refs):
        out_ref = refs[n_inputs]
        acc = refs[0][...]
        for r in refs[1:n_inputs]:
            acc = acc + r[...]
        out_ref[...] = acc

    return add_kernel


def _run_add(flat_inputs, rows, lanes, dtype, n_elems_logical):
    """Run the tiled add on 2D (rows, lanes) slabs."""
    n = len(flat_inputs)
    itemsize = jnp.dtype(dtype).itemsize
    min_sub = _min_sublane(dtype)

    # --- tile-row selection from a VMEM byte budget -------------------------
    # Double-buffered footprint = 2 * (n_inputs + 1) * tm * lanes * itemsize.
    per_block_budget = _VMEM_BUDGET_BYTES // (2 * (n + 1))
    per_block_budget = min(per_block_budget, _TARGET_BLOCK_BYTES)
    tm = (per_block_budget // (lanes * itemsize)) // min_sub * min_sub
    tm = max(min_sub, tm)
    tm = min(tm, rows)  # rows is always a multiple of min_sub here

    # Give both v7x TensorCores grid work (and balance blocks) for big inputs.
    total_bytes = rows * lanes * itemsize
    if total_bytes >= 2 * 1024 * 1024 and rows >= 2 * min_sub:
        tm = min(tm, _round_up(pl.cdiv(rows, 2), min_sub))

    grid = (pl.cdiv(rows, tm),)  # partial last block is masked by Pallas
    spec = pl.BlockSpec((tm, lanes), lambda i: (i, 0))

    return pl.pallas_call(
        _make_add_kernel(n),
        out_shape=jax.ShapeDtypeStruct((rows, lanes), dtype),
        grid_spec=pltpu.PrefetchScalarGridSpec(
            num_scalar_prefetch=0,
            grid=grid,
            in_specs=[spec] * n,
            out_specs=spec,
        ),
        compiler_params=pltpu.CompilerParams(
            dimension_semantics=("parallel",),
            vmem_limit_bytes=_VMEM_LIMIT_BYTES,
        ),
        cost_estimate=pl.CostEstimate(
            flops=max(n - 1, 0) * n_elems_logical,
            transcendentals=0,
            bytes_accessed=(n + 1) * n_elems_logical * itemsize,
        ),
    )(*flat_inputs)


def pallas_add(inputs):
    """Elementwise sum of a list of same-shaped, same-dtype arrays.

    Matches `Add.forward(inputs) == sum(inputs)` from the PyTorch module.
    """
    inputs = list(inputs)
    assert len(inputs) >= 1
    orig_shape = inputs[0].shape
    dtype = inputs[0].dtype
    for x in inputs:
        assert x.shape == orig_shape and x.dtype == dtype

    n_elems = 1
    for d in orig_shape:
        n_elems *= d
    min_sub = _min_sublane(dtype)

    # Fast path: a wide lane width that evenly divides the element count with
    # a min-tile-aligned row count -> only free reshapes, no pad / slice copies.
    for lanes in _LANE_CANDIDATES:
        if n_elems % lanes == 0 and (n_elems // lanes) % min_sub == 0:
            rows = n_elems // lanes
            flat = [x.reshape(rows, lanes) for x in inputs]
            out = _run_add(flat, rows, lanes, dtype, n_elems)
            return out.reshape(orig_shape)

    # Fallback for awkward sizes: pad the flattened inputs up to a
    # (min_sub, 128)-aligned slab, then strip the padding from the output.
    lanes = 128
    rows = _round_up(pl.cdiv(n_elems, lanes), min_sub)
    padded = rows * lanes
    flat = []
    for x in inputs:
        xf = jnp.ravel(x)
        xf = jnp.pad(xf, (0, padded - n_elems))
        flat.append(xf.reshape(rows, lanes))
    out = _run_add(flat, rows, lanes, dtype, n_elems)
    return jnp.ravel(out)[:n_elems].reshape(orig_shape)


if __name__ == "__main__":
    key = jax.random.PRNGKey(0)
    k1, k2, k3, k4, k5 = jax.random.split(key, 5)

    # Main check: NCHW inputs, aligned fast path.
    shape = (2, 4, 16, 16)
    a = jax.random.normal(k1, shape, dtype=jnp.float32)
    b = jax.random.normal(k2, shape, dtype=jnp.float32)
    c = jax.random.normal(k3, shape, dtype=jnp.float32)

    out = jax.block_until_ready(pallas_add([a, b, c]))
    ref = a + b + c
    assert out.shape == ref.shape
    assert jnp.allclose(out, ref, atol=1e-6), "mismatch vs reference (aligned path)"

    # Secondary check: awkward (non-128-divisible) size exercises the fallback.
    shape2 = (3, 5, 7, 11)
    d = jax.random.normal(k4, shape2, dtype=jnp.float32)
    e = jax.random.normal(k5, shape2, dtype=jnp.float32)
    out2 = jax.block_until_ready(pallas_add([d, e]))
    ref2 = d + e
    assert out2.shape == ref2.shape
    assert jnp.allclose(out2, ref2, atol=1e-6), "mismatch vs reference (fallback path)"

    print("KERNEL_OK")
</pallas_src>

<mosaic_0001>
module attributes {stable_mosaic.version = 11 : i64} {
  func.func @add_kernel(%arg0: i32, %arg1: memref<8x256xf32, #tpu.memory_space<vmem>>, %arg2: memref<8x256xf32, #tpu.memory_space<vmem>>, %arg3: memref<8x256xf32, #tpu.memory_space<vmem>>, %arg4: memref<8x256xf32, #tpu.memory_space<vmem>>) attributes {dimension_semantics = [#tpu.dimension_semantics<parallel>], iteration_bounds = array<i64: 1>, scalar_prefetch = 0 : i64, scratch_operands = 0 : i64, tpu.core_type = #tpu.core_type<tc>, window_params = [{transform_indices = @transform_0, window_bounds = array<i64: 8, 256>}, {transform_indices = @transform_1, window_bounds = array<i64: 8, 256>}, {transform_indices = @transform_2, window_bounds = array<i64: 8, 256>}, {transform_indices = @transform_3, window_bounds = array<i64: 8, 256>}]} {
    %c0 = arith.constant 0 : index
    %c0_0 = arith.constant 0 : index
    %0 = vector.load %arg1[%c0, %c0_0] : memref<8x256xf32, #tpu.memory_space<vmem>>, vector<8x256xf32>
    %c0_1 = arith.constant 0 : index
    %c0_2 = arith.constant 0 : index
    %1 = vector.load %arg2[%c0_1, %c0_2] : memref<8x256xf32, #tpu.memory_space<vmem>>, vector<8x256xf32>
    %2 = arith.addf %0, %1 : vector<8x256xf32>
    %c0_3 = arith.constant 0 : index
    %c0_4 = arith.constant 0 : index
    %3 = vector.load %arg3[%c0_3, %c0_4] : memref<8x256xf32, #tpu.memory_space<vmem>>, vector<8x256xf32>
    %4 = arith.addf %2, %3 : vector<8x256xf32>
    %c0_5 = arith.constant 0 : index
    %c0_6 = arith.constant 0 : index
    %5 = vector.load %arg4[%c0_5, %c0_6] : memref<8x256xf32, #tpu.memory_space<vmem>>, vector<8x256xf32>
    tpu.vector_store %arg4[%c0_5, %c0_6], %4 {strides = array<i32>} : memref<8x256xf32, #tpu.memory_space<vmem>>, vector<8x256xf32>,
    return
  }
  func.func @transform_0(%arg0: i32) -> (i32, i32) {
    %c0_i32 = arith.constant 0 : i32
    %c0_i32_0 = arith.constant 0 : i32
    return %arg0, %c0_i32 : i32, i32
  }
  func.func @transform_1(%arg0: i32) -> (i32, i32) {
    %c0_i32 = arith.constant 0 : i32
    %c0_i32_0 = arith.constant 0 : i32
    return %arg0, %c0_i32 : i32, i32
  }
  func.func @transform_2(%arg0: i32) -> (i32, i32) {
    %c0_i32 = arith.constant 0 : i32
    %c0_i32_0 = arith.constant 0 : i32
    return %arg0, %c0_i32 : i32, i32
  }
  func.func @transform_3(%arg0: i32) -> (i32, i32) {
    %c0_i32 = arith.constant 0 : i32
    %c0_i32_0 = arith.constant 0 : i32
    return %arg0, %c0_i32 : i32, i32
  }
}

</mosaic_0001>

<bundles_post_ra>
// kernel: tpu_custom_call.1
= control target key start
LH: loop header
LB: loop body
LE: loop exit
PB: predicated region body
PF: predicated region fallthrough
CT: control target
= control target key end

     0   :  { %8 = vsyncpa [#allocation3], 0  ;;  %s248_s0 = inlined_call_operand.hbm [shape: f32[8,256], index: 0, kind: input, shape index: {}]   ;;  %s249_s1 = inlined_call_operand.hbm [shape: f32[8,256], index: 1, kind: input, shape index: {}]   ;;  %s250_s2 = inlined_call_operand.hbm [shape: f32[8,256], index: 2, kind: input, shape index: {}]   ;;  %s251_s3 = inlined_call_operand.hbm [shape: f32[8,256], index: 3, kind: output, shape index: {}]  }
   0x1   :  { %9 = vsyncpa [#allocation6], 0 }
   0x2   :  { %10 = vsyncpa [#allocation4], 0  ;;  %s176_s12 = smov [#allocation5]   ;;  %s177_s14 = smov [#allocation2]  }
   0x3   :  { %s27_s13 = sshll.u32 %s176_s12, 4  ;;  %s17_s15 = sshll.u32 %s177_s14, 4  ;;  %s28_s13 = int_to_ptr.vmem [resolvable:$true] %s27_s13  ;;  %s18_s15 = int_to_ptr.vmem [resolvable:$true] %s17_s15 }
   0x4   :  { %s82_s18 = scalar_lea.hbm %s249_s1, 256 }
   0x5   :  { %p83_p0 = scmp.ne.s32.totalorder %s249_s1, %s82_s18  ;;  %p86_p1 = scmp.lt.u32.totalorder %s82_s18, %s249_s1 }
   0x7   :  { %p88_p2 = pnand %p86_p1, %p83_p0 }
   0x9   :  { %91 = shalt.err (!%p88_p2)
}
   0xa   :  { %s92_s23 = scalar_lea.vmem %s28_s13, 256  ;;  %p97_p4 = scmp.lt.s32.totalorder %s28_s13, %s28_s13 }
   0xb   :  { %p93_p3 = scmp.ne.s32.totalorder %s28_s13, %s92_s23  ;;  %p98_p5 = scmp.lt.s32.totalorder %s92_s23, %s92_s23 }
   0xd   :  { %p99_p6 = por %p98_p5, %p97_p4 }
   0xf   :  { %p100_p7 = pnand %p99_p6, %p93_p3 }
  0x11   :  { %103 = shalt.err (!%p100_p7)
}
  0x12   :  { %30 = dma.hbm_to_vmem [thread:$0]  %s249_s1, 256, %s28_s13, [#allocation6]  }
  0x13   :  { %s104_s28 = scalar_lea.hbm %s248_s0, 256 }
  0x14   :  { %p105_p8 = scmp.ne.s32.totalorder %s248_s0, %s104_s28  ;;  %p108_p9 = scmp.lt.u32.totalorder %s104_s28, %s248_s0 }
  0x16   :  { %p110_p10 = pnand %p108_p9, %p105_p8 }
  0x18   :  { %113 = shalt.err (!%p110_p10)
}
  0x19   :  { %s114_s6 = scalar_lea.vmem %s18_s15, 256  ;;  %p119_p12 = scmp.lt.s32.totalorder %s18_s15, %s18_s15 }
  0x1a   :  { %p115_p11 = scmp.ne.s32.totalorder %s18_s15, %s114_s6  ;;  %p120_p13 = scmp.lt.s32.totalorder %s114_s6, %s114_s6 }
  0x1c   :  { %p121_p0 = por %p120_p13, %p119_p12 }
  0x1e   :  { %p122_p1 = pnand %p121_p0, %p115_p11 }
  0x20   :  { %125 = shalt.err (!%p122_p1)
}
  0x21   :  { %20 = dma.hbm_to_vmem [thread:$0]  %s248_s0, 256, %s18_s15, [#allocation3]  }
  0x22   :  { %s178_s8 = smov [#allocation7]   ;;  %s126_s12 = scalar_lea.hbm %s250_s2, 256 }
  0x23   :  { %s37_s9 = sshll.u32 %s178_s8, 4  ;;  %p127_p2 = scmp.ne.s32.totalorder %s250_s2, %s126_s12  ;;  %s38_s9 = int_to_ptr.vmem [resolvable:$true] %s37_s9 }
  0x24   :  { %p130_p3 = scmp.lt.u32.totalorder %s126_s12, %s250_s2 }
  0x26   :  { %p132_p4 = pnand %p130_p3, %p127_p2 }
  0x28   :  { %135 = shalt.err (!%p132_p4)
}
  0x29   :  { %s136_s18 = scalar_lea.vmem %s38_s9, 256  ;;  %p141_p6 = scmp.lt.s32.totalorder %s38_s9, %s38_s9 }
  0x2a   :  { %p137_p5 = scmp.ne.s32.totalorder %s38_s9, %s136_s18  ;;  %p142_p7 = scmp.lt.s32.totalorder %s136_s18, %s136_s18 }
  0x2c   :  { %p143_p8 = por %p142_p7, %p141_p6 }
  0x2e   :  { %p144_p9 = pnand %p143_p8, %p137_p5 }
  0x30   :  { %147 = shalt.err (!%p144_p9)
}
  0x31   :  { %40 = dma.hbm_to_vmem [thread:$0]  %s250_s2, 256, %s38_s9, [#allocation6]  }
  0x32   :  { %170 = dma.done.wait [#allocation3], 256  }
  0x33   :  { %171 = vsyncadd [#allocation3], 4294967040 }
  0x34   :  { %172 = dma.done.wait [#allocation6], 512  }
  0x35   :  { %173 = vsyncadd [#allocation6], 4294966784  ;;  %v50_v0 = vld [vmem:[#allocation2] sm:$0xff]  ;;  %v52_v1 = vld [vmem:[#allocation5] sm:$0xff]  ;;  %s179_s19 = smov [#allocation8]  }
  0x36   :  { %v56_v2 = vld [vmem:[#allocation7] sm:$0xff]  ;;  %v54_v3 = vadd.f32 %v52_v1, %v50_v0  ;;  %v51_v4 = vld [vmem:[#allocation2 + $0x8] sm:$0xff]  ;;  %v53_v5 = vld [vmem:[#allocation5 + $0x8] sm:$0xff]  ;;  %s68_s20 = sshll.u32 %s179_s19, 4  ;;  %s69_s20 = int_to_ptr.vmem [resolvable:$true] %s68_s20 }
  0x37   :  { %v57_v6 = vld [vmem:[#allocation7 + $0x8] sm:$0xff]  ;;  %v55_v7 = vadd.f32 %v53_v5, %v51_v4  ;;  %s148_s2 = scalar_lea.vmem %s69_s20, 256  ;;  %p153_p11 = scmp.lt.s32.totalorder %s69_s20, %s69_s20 }
  0x38   :  { %v58_v8 = vadd.f32 %v56_v2, %v54_v3  ;;  %p149_p10 = scmp.ne.s32.totalorder %s69_s20, %s148_s2  ;;  %p154_p12 = scmp.lt.s32.totalorder %s148_s2, %s148_s2 }
  0x39   :  { %v59_v9 = vadd.f32 %v57_v6, %v55_v7 }
  0x3a   :  { %60 = vst [vmem:[#allocation8] sm:$0xff] %v58_v8  ;;  %p155_p13 = por %p154_p12, %p153_p11 }
  0x3b   :  { %61 = vst [vmem:[#allocation8 + $0x8] sm:$0xff] %v59_v9 }
  0x3c   :  { %p156_p0 = pnand %p155_p13, %p149_p10 }
  0x3e   :  { %159 = shalt.err (!%p156_p0)
}
  0x3f   :  { %s160_s23 = scalar_lea.hbm %s251_s3, 256 }
  0x40   :  { %p161_p1 = scmp.ne.s32.totalorder %s251_s3, %s160_s23  ;;  %p164_p2 = scmp.lt.u32.totalorder %s160_s23, %s251_s3 }
  0x42   :  { %p166_p3 = pnand %p164_p2, %p161_p1 }
  0x44   :  { %169 = shalt.err (!%p166_p3)
}
  0x45   :  { %71 = dma.vmem_to_hbm [thread:$0]  %s69_s20, 256, %s251_s3, [#allocation4]  }
  0x46   :  { %174 = dma.done.wait [#allocation4], 256  }
  0x47   :  { %175 = vsyncadd [#allocation4], 4294967040 }
  0x48   :  { %75 = vsyncpa [#allocation3], 1 }
  0x49   :  { %76 = vsyncpa [#allocation6], 1 }
  0x4a   :  { %77 = vsyncpa [#allocation4], 1 }

</bundles_post_ra>
